<compile_context>
chip_gen: v5e
topology: v5e:2x2
jax: 0.10.0
libtpu: 0.0.40
codegen_flags: <defaults>
</compile_context>

<pallas_src>
import functools
import math

import jax
import jax.numpy as jnp
from jax.experimental import pallas as pl
from jax.experimental.pallas import tpu as pltpu


def build_pe_table(d_model: int, max_len: int) -> jnp.ndarray:
    """Deterministic positional-encoding buffer, shape [1, max_len, d_model]."""
    position = jnp.arange(max_len, dtype=jnp.float32)[:, None]            # [L, 1]
    div_term = jnp.exp(
        jnp.arange(0, d_model, 2, dtype=jnp.float32)
        * (-math.log(10000.0) / d_model)
    )                                                                      # [D/2]
    pe = jnp.zeros((max_len, d_model), dtype=jnp.float32)
    pe = pe.at[:, 0::2].set(jnp.sin(position * div_term))
    pe = pe.at[:, 1::2].set(jnp.cos(position * div_term))
    return pe[None, :, :]                                                  # [1, L, D]


# ---------------------------------------------------------------------------
# Kernels (operate on 2-D views: x/out [TS, L*D], pe [1, L*D] broadcast add)
# ---------------------------------------------------------------------------
def _pe_add_kernel(x_ref, pe_ref, o_ref):
    # eval-mode forward: x + pe  (dropout is identity in eval)
    y = x_ref[...].astype(jnp.float32) + pe_ref[...].astype(jnp.float32)
    o_ref[...] = y.astype(o_ref.dtype)


def _pe_add_dropout_kernel(x_ref, pe_ref, bits_ref, o_ref, *, threshold, scale):
    # train-mode forward: inverted dropout of (x + pe).
    # bits are uint32; unsigned compare against uint32 threshold = p * 2^32.
    y = x_ref[...].astype(jnp.float32) + pe_ref[...].astype(jnp.float32)
    keep = bits_ref[...] >= jnp.uint32(threshold)
    o_ref[...] = jnp.where(keep, y * jnp.float32(scale), jnp.zeros_like(y)).astype(o_ref.dtype)


# ---------------------------------------------------------------------------
# Tiling / wrapper
# ---------------------------------------------------------------------------
_VMEM_PIPELINE_BUDGET = 16 * 1024 * 1024   # bytes for double-buffered tiles (safe on all gens)
_VMEM_LIMIT_BYTES = 32 * 1024 * 1024       # <= physical VMEM on v5e/v6e (128 MiB) and v7x (64 MiB)


def _pick_tile_rows(n_rows: int, row_bytes: int, n_streams: int) -> int:
    """Largest S-tile whose double-buffered streams fit the VMEM budget."""
    ts = max(1, _VMEM_PIPELINE_BUDGET // (2 * n_streams * row_bytes))
    if ts >= n_rows:
        return n_rows
    ts = max(8, (ts // 8) * 8)              # keep sublane dim 8-aligned
    return min(ts, n_rows)


def positional_encoding_forward(
    x: jnp.ndarray,
    pe: jnp.ndarray,
    *,
    dropout_p: float = 0.1,
    training: bool = False,
    rng_key=None,
    seed: int = 0,
) -> jnp.ndarray:
    """x: [S, L, D]; pe: [1, L, D] -> [S, L, D]."""
    S, L, D = x.shape
    assert pe.shape == (1, L, D)
    row = L * D
    itemsize = jnp.dtype(x.dtype).itemsize

    # Lane-dense 2-D views: last dim is the full L*D extent (>= 128-wide for
    # real transformer shapes; far better than a 32-wide masked-store path).
    x2 = x.reshape(S, row)
    pe2 = pe.reshape(1, row)
    out_shape = jax.ShapeDtypeStruct((S, row), x.dtype)
    pe_spec = pl.BlockSpec((1, row), lambda s: (0, 0))
    compiler_params = pltpu.CompilerParams(
        dimension_semantics=("parallel",),
        vmem_limit_bytes=_VMEM_LIMIT_BYTES,
    )

    if (not training) or dropout_p == 0.0:
        ts = _pick_tile_rows(S, row * itemsize, n_streams=2)   # x + out
        grid = (pl.cdiv(S, ts),)
        xo_spec = pl.BlockSpec((ts, row), lambda s: (s, 0))
        cost = pl.CostEstimate(
            flops=S * row,
            transcendentals=0,
            bytes_accessed=(2 * S * row + row) * itemsize,
        )
        out2 = pl.pallas_call(
            _pe_add_kernel,
            out_shape=out_shape,
            grid_spec=pltpu.PrefetchScalarGridSpec(
                num_scalar_prefetch=0,
                grid=grid,
                in_specs=[xo_spec, pe_spec],
                out_specs=xo_spec,
            ),
            compiler_params=compiler_params,
            cost_estimate=cost,
        )(x2, pe2)
        return out2.reshape(S, L, D)

    # ---- training path (dropout) ----
    if dropout_p >= 1.0:
        # torch drops everything at p == 1 (and 1/(1-p) would overflow the threshold)
        return jnp.zeros_like(x)

    if rng_key is None:
        rng_key = jax.random.PRNGKey(seed)
    # TODO(synk): torch's dropout RNG stream cannot be reproduced bit-exactly;
    # statistics (keep prob 1-p, 1/(1-p) scaling) match.  Bits are generated
    # host-side with jax.random (pltpu.prng_* has no interpret/CPU lowering).
    bits = jax.random.bits(rng_key, (S, row), dtype=jnp.uint32)

    threshold = min(int(round(dropout_p * float(2**32))), 2**32 - 1)
    scale = 1.0 / (1.0 - dropout_p)

    ts = _pick_tile_rows(S, row * itemsize, n_streams=3)        # x + bits + out
    grid = (pl.cdiv(S, ts),)
    xo_spec = pl.BlockSpec((ts, row), lambda s: (s, 0))
    bits_spec = pl.BlockSpec((ts, row), lambda s: (s, 0))
    cost = pl.CostEstimate(
        flops=3 * S * row,
        transcendentals=0,
        bytes_accessed=(3 * S * row + row) * itemsize + S * row * 4,
    )
    out2 = pl.pallas_call(
        functools.partial(_pe_add_dropout_kernel, threshold=threshold, scale=scale),
        out_shape=out_shape,
        grid_spec=pltpu.PrefetchScalarGridSpec(
            num_scalar_prefetch=0,
            grid=grid,
            in_specs=[xo_spec, pe_spec, bits_spec],
            out_specs=xo_spec,
        ),
        compiler_params=compiler_params,
        cost_estimate=cost,
    )(x2, pe2, bits)
    return out2.reshape(S, L, D)


# ---------------------------------------------------------------------------
if __name__ == "__main__":
    d_model = 32
    max_len = 10
    seq_len = 8
    p = 0.1

    key = jax.random.PRNGKey(0)
    kx, kd = jax.random.split(key)
    x = jax.random.normal(kx, (seq_len, max_len, d_model), dtype=jnp.float32)
    pe = build_pe_table(d_model, max_len)

    # eval-mode forward (dropout == identity): must match x + pe exactly
    out = positional_encoding_forward(x, pe, dropout_p=p, training=False)
    out = jax.block_until_ready(out)
    ref = x + pe
    assert out.shape == (seq_len, max_len, d_model)
    assert jnp.allclose(out, ref, atol=1e-6), "eval-mode mismatch vs reference"

    # training-mode forward: kept elements equal (x+pe) * 1/(1-p), dropped are 0
    out_tr = positional_encoding_forward(x, pe, dropout_p=p, training=True, rng_key=kd)
    out_tr = jax.block_until_ready(out_tr)
    assert out_tr.shape == (seq_len, max_len, d_model)
    kept = out_tr != 0
    expected_kept = ref * jnp.float32(1.0 / (1.0 - p))
    assert jnp.allclose(
        jnp.where(kept, out_tr, 0.0), jnp.where(kept, expected_kept, 0.0), atol=1e-5
    ), "train-mode kept values mismatch"

    print("KERNEL_OK")
</pallas_src>

<mosaic_0001>
module attributes {stable_mosaic.version = 11 : i64} {
  func.func @_pe_add_kernel(%arg0: i32, %arg1: memref<8x320xf32, #tpu.memory_space<vmem>>, %arg2: memref<1x320xf32, #tpu.memory_space<vmem>>, %arg3: memref<8x320xf32, #tpu.memory_space<vmem>>) attributes {dimension_semantics = [#tpu.dimension_semantics<parallel>], iteration_bounds = array<i64: 1>, scalar_prefetch = 0 : i64, scratch_operands = 0 : i64, tpu.core_type = #tpu.core_type<tc>, window_params = [{transform_indices = @transform_0, window_bounds = array<i64: 8, 320>}, {pipeline_mode = #tpu.pipeline_mode<synchronous>, transform_indices = @transform_1, window_bounds = array<i64: 1, 320>}, {transform_indices = @transform_2, window_bounds = array<i64: 8, 320>}]} {
    %c0 = arith.constant 0 : index
    %c0_0 = arith.constant 0 : index
    %0 = vector.load %arg1[%c0, %c0_0] : memref<8x320xf32, #tpu.memory_space<vmem>>, vector<8x320xf32>
    %c0_1 = arith.constant 0 : index
    %c0_2 = arith.constant 0 : index
    %1 = vector.load %arg2[%c0_1, %c0_2] : memref<1x320xf32, #tpu.memory_space<vmem>>, vector<1x320xf32>
    %2 = vector.broadcast %1 : vector<1x320xf32> to vector<8x320xf32>
    %3 = arith.addf %0, %2 : vector<8x320xf32>
    %c0_3 = arith.constant 0 : index
    %c0_4 = arith.constant 0 : index
    %4 = vector.load %arg3[%c0_3, %c0_4] : memref<8x320xf32, #tpu.memory_space<vmem>>, vector<8x320xf32>
    tpu.vector_store %arg3[%c0_3, %c0_4], %3 {strides = array<i32>} : memref<8x320xf32, #tpu.memory_space<vmem>>, vector<8x320xf32>,
    return
  }
  func.func @transform_0(%arg0: i32) -> (i32, i32) {
    %c0_i32 = arith.constant 0 : i32
    %c0_i32_0 = arith.constant 0 : i32
    return %arg0, %c0_i32 : i32, i32
  }
  func.func @transform_1(%arg0: i32) -> (i32, i32) {
    %c0_i32 = arith.constant 0 : i32
    %c0_i32_0 = arith.constant 0 : i32
    %c0_i32_1 = arith.constant 0 : i32
    return %c0_i32, %c0_i32_0 : i32, i32
  }
  func.func @transform_2(%arg0: i32) -> (i32, i32) {
    %c0_i32 = arith.constant 0 : i32
    %c0_i32_0 = arith.constant 0 : i32
    return %arg0, %c0_i32 : i32, i32
  }
}

</mosaic_0001>

<bundles_post_ra>
// kernel: tpu_custom_call.1
= control target key start
LH: loop header
LB: loop body
LE: loop exit
PB: predicated region body
PF: predicated region fallthrough
CT: control target
= control target key end

     0   :  { %7 = vsyncpa [#allocation3], 0  ;;  %s184_s0 = inlined_call_operand.hbm [shape: f32[8,320], index: 0, kind: input, shape index: {}]   ;;  %s185_s1 = inlined_call_operand.hbm [shape: f32[1,320], index: 1, kind: input, shape index: {}]   ;;  %s186_s2 = inlined_call_operand.hbm [shape: f32[8,320], index: 2, kind: output, shape index: {}]  }
   0x1   :  { %8 = vsyncpa [#allocation6], 0 }
   0x2   :  { %9 = vsyncpa [#allocation4], 0  ;;  %s15_s11 = sshll.u32 %s184_s0, 4  ;;  %s157_s12 = smov [#allocation2]   ;;  %s16_s11 = int_to_ptr.hbm [resolvable:$true] %s15_s11 }
   0x3   :  { %s17_s13 = sshll.u32 %s157_s12, 4  ;;  %s26_s16 = sshll.u32 %s185_s1, 4  ;;  %s18_s13 = int_to_ptr.vmem [resolvable:$true] %s17_s13  ;;  %s27_s16 = int_to_ptr.hbm [resolvable:$true] %s26_s16 }
   0x4   :  { %20 = dma.hbm_to_vmem [thread:$0]  %s16_s11, 384, %s18_s13, [#allocation3]  }
   0x5   :  { %s158_s17 = smov [#allocation5]  }
   0x6   :  { %s28_s18 = sshll.u32 %s158_s17, 4  ;;  %s29_s18 = int_to_ptr.vmem [resolvable:$true] %s28_s18 }
   0x7   :  { %31 = dma.hbm_to_vmem [thread:$0]  %s27_s16, 48, %s29_s18, [#allocation6]  }
   0x8   :  { %151 = dma.done.wait [#allocation3], 384  }
   0x9   :  { %152 = vsyncadd [#allocation3], 4294966912 }
   0xa   :  { %153 = dma.done.wait [#allocation6], 48  }
   0xb   :  { %154 = vsyncadd [#allocation6], 4294967248  ;;  %v40_v0 = vld [vmem:[#allocation2] sm:$0xff]  ;;  %v43_v1 = vld [vmem:[#allocation5] sm:$0x7]  ;;  %s159_s0 = smov [#allocation7]  }
   0xc   :  { %v41_v2 = vld [vmem:[#allocation2 + $0x8] sm:$0xff]  ;;  %v45_v3 = vperm.slane %v43_v1, 0  ;;  %v46_v4 = vperm.slane %v43_v1, 1  ;;  %v42_v5 = vld [vmem:[#allocation2 + $0x10] sm:$0xff]  ;;  %v47_v6 = vperm.slane %v43_v1, 2  ;;  %s63_s19 = sshll.u32 %s159_s0, 4  ;;  %s64_s19 = int_to_ptr.vmem [resolvable:$true] %s63_s19 }
   0xd   :  { %s65_s21 = sshll.u32 %s186_s2, 4  ;;  %vm56_vm0 = vcmask 523264   ;;  %s66_s21 = int_to_ptr.hbm [resolvable:$true] %s65_s21 }
   0xe   :  { %v51_v7 = vadd.f32 %v45_v3, %v40_v0  ;;  %v52_v8 = vadd.f32 %v46_v4, %v41_v2  ;;  %v53_v9 = vadd.f32 %v47_v6, %v42_v5 }
  0x10   :  { %54 = vst [vmem:[#allocation7] sm:$0xff] %v51_v7 }
  0x11   :  { %55 = vst [vmem:[#allocation7 + $0x8] sm:$0xff] %v52_v8 }
  0x12   :  { %57 = vst.msk [vmem:[#allocation7 + $0x10] sm:$0xff] %vm56_vm0, %v53_v9 }
  0x13   :  { %68 = dma.vmem_to_hbm [thread:$0]  %s64_s19, 384, %s66_s21, [#allocation4]  }
  0x14   :  { %155 = dma.done.wait [#allocation4], 384  }
  0x15   :  { %156 = vsyncadd [#allocation4], 4294966912 }
  0x16   :  { %73 = vsyncpa [#allocation3], 1 }
  0x17   :  { %74 = vsyncpa [#allocation6], 1 }
  0x18   :  { %75 = vsyncpa [#allocation4], 1 }

</bundles_post_ra>
